<compile_context>
chip_gen: v6e
topology: v6e:2x2x1
jax: 0.10.0
libtpu: 0.0.40
codegen_flags: <defaults>
</compile_context>

<pallas_src>
import math

import jax
import jax.numpy as jnp
import numpy as np
from jax.experimental import pallas as pl
from jax.experimental.pallas import tpu as pltpu

# ---- model hyper-params (small, consistent with the module) ----
BATCH = 2
SEQ = 8
HIDDEN = 32
NUM_HEADS = 4
HEAD = HIDDEN // NUM_HEADS
LN_EPS = 1e-12


def self_attention_kernel(
    x_ref, mask_ref,
    wqkv_ref, bqkv_ref,
    wd_ref, bd_ref,
    gamma_ref, beta_ref,
    o_ref,
):
    B, S, H, NH, HD = BATCH, SEQ, HIDDEN, NUM_HEADS, HEAD
    TH = 3 * HD  # q|k|v columns per head in the head-major fused projection

    x = x_ref[...]  # (B*S, H) float32, whole batch flattened

    # ---- fused QKV projection: one (B*S, H) x (H, 3H) MXU push.
    # Column layout is head-major [head, {q,k,v}, d]; Q columns and Q bias are
    # pre-scaled by 1/sqrt(HEAD) at parameter-prep time.
    qkv = jnp.dot(x, wqkv_ref[...], preferred_element_type=jnp.float32) + bqkv_ref[...]  # (B*S, NH*TH)

    # ---- one structured relayout to the head-batched layout (B*NH, S, 3*HD):
    # a single contiguous 24-lane slice per head, stacked on a new leading axis.
    per_head = [qkv[:, h * TH:(h + 1) * TH].reshape(B, 1, S, TH) for h in range(NH)]
    qkv_h = jnp.concatenate(per_head, axis=1).reshape(B * NH, S, TH)

    q = qkv_h[..., 0:HD]            # (B*NH, S, HD), already scaled
    k = qkv_h[..., HD:2 * HD]       # (B*NH, S, HD)
    v = qkv_h[..., 2 * HD:3 * HD]   # (B*NH, S, HD)

    # ---- additive mask, broadcast once (hoisted): (B, S) -> (B*NH, 1, S)
    mask_bh = jnp.broadcast_to(
        mask_ref[...][:, None, None, :], (B, NH, 1, S)).reshape(B * NH, 1, S)

    # ---- batched scores + single softmax over the whole (B*NH, S, S) slab
    scores = jnp.einsum("bqd,bkd->bqk", q, k,
                        preferred_element_type=jnp.float32) + mask_bh
    m = jnp.max(scores, axis=-1, keepdims=True)
    e = jnp.exp(scores - m)
    denom = jnp.sum(e, axis=-1, keepdims=True)
    probs = e / denom               # exact divide (parity with reference softmax)

    # ---- batched context, then lane-axis head concat -> (B*S, H)
    ctx = jnp.einsum("bqk,bkd->bqd", probs, v,
                     preferred_element_type=jnp.float32)        # (B*NH, S, HD)
    ctx4 = ctx.reshape(B, NH, S, HD)
    ctx_cat = jnp.concatenate([ctx4[:, h] for h in range(NH)],
                              axis=-1).reshape(B * S, H)        # (B*S, H)

    # ---- single dense matmul + bias + residual + TF-style LayerNorm
    hidden = jnp.dot(ctx_cat, wd_ref[...],
                     preferred_element_type=jnp.float32) + bd_ref[...] + x

    u = jnp.mean(hidden, axis=-1, keepdims=True)
    diff = hidden - u
    var = jnp.mean(diff * diff, axis=-1, keepdims=True)
    normed = diff * jax.lax.rsqrt(var + LN_EPS)

    # single whole-batch (B*S, H) store
    o_ref[...] = gamma_ref[...] * normed + beta_ref[...]


def prepare_params(params):
    """One-time parameter transform (NOT per forward call).

    Fuses Wq|Wk|Wv into a head-major (H, NH*3*HEAD) matrix and folds the
    1/sqrt(HEAD) attention scale into the Q columns / Q bias.
    """
    scale = 1.0 / math.sqrt(HEAD)
    wq = params["wq"] * scale
    bq = params["bq"] * scale

    def w_heads(w):  # (H, H) -> (H, NH, HEAD)
        return w.reshape(HIDDEN, NUM_HEADS, HEAD)

    def b_heads(b):  # (1, H) -> (1, NH, HEAD)
        return b.reshape(1, NUM_HEADS, HEAD)

    # column index = head*3*HEAD + {q,k,v}*HEAD + d
    wqkv = jnp.stack([w_heads(wq), w_heads(params["wk"]), w_heads(params["wv"])],
                     axis=2).reshape(HIDDEN, NUM_HEADS * 3 * HEAD)
    bqkv = jnp.stack([b_heads(bq), b_heads(params["bk"]), b_heads(params["bv"])],
                     axis=2).reshape(1, NUM_HEADS * 3 * HEAD)

    return {"wqkv": wqkv, "bqkv": bqkv, "wd": params["wd"], "bd": params["bd"],
            "gamma": params["gamma"], "beta": params["beta"]}


def self_attention(x, mask, fused):
    """x: (B, S, H) f32, mask: (B, S) f32 additive mask, fused: prepare_params(...)."""
    B, S, H = x.shape

    # flatten batch for the projections (pure contiguous view)
    x2d = x.reshape(B * S, H)

    full = lambda shape: pl.BlockSpec(shape, lambda i: (0, 0))

    in_specs = [
        full((B * S, H)),     # x (flattened)
        full((B, S)),         # additive mask
        full((H, 3 * H)),     # fused head-major Wqkv (Q pre-scaled)
        full((1, 3 * H)),     # fused bias
        full((H, H)),         # Wd
        full((1, H)),         # bd
        full((1, H)),         # gamma
        full((1, H)),         # beta
    ]

    out2d = pl.pallas_call(
        self_attention_kernel,
        out_shape=jax.ShapeDtypeStruct((B * S, H), jnp.float32),
        grid=(1,),
        in_specs=in_specs,
        out_specs=full((B * S, H)),
        compiler_params=pltpu.CompilerParams(
            dimension_semantics=("arbitrary",)
        ),
    )(x2d, mask, fused["wqkv"], fused["bqkv"], fused["wd"], fused["bd"],
      fused["gamma"], fused["beta"])

    return out2d.reshape(B, S, H)


def reference_forward(x, mask, params):
    """Pure-JAX reference mirroring the PyTorch forward (dropout = identity)."""
    B, S, H = x.shape
    q = x @ params["wq"] + params["bq"]
    k = x @ params["wk"] + params["bk"]
    v = x @ params["wv"] + params["bv"]

    def split(t):  # (B,S,H) -> (B,nh,S,hd)
        return t.reshape(B, S, NUM_HEADS, HEAD).transpose(0, 2, 1, 3)

    qh, kh, vh = split(q), split(k), split(v)
    scores = jnp.einsum("bhqd,bhkd->bhqk", qh, kh) / math.sqrt(HEAD)
    scores = scores + mask[:, None, None, :]
    probs = jax.nn.softmax(scores, axis=-1)
    ctx = jnp.einsum("bhqk,bhkd->bhqd", probs, vh)
    ctx = ctx.transpose(0, 2, 1, 3).reshape(B, S, H)
    hidden = ctx @ params["wd"] + params["bd"]
    hidden = hidden + x
    u = jnp.mean(hidden, axis=-1, keepdims=True)
    s = jnp.mean((hidden - u) ** 2, axis=-1, keepdims=True)
    normed = (hidden - u) / jnp.sqrt(s + LN_EPS)
    return params["gamma"][0] * normed + params["beta"][0]


def make_params(key):
    ks = jax.random.split(key, 8)
    init = lambda k: (jax.random.normal(k, (HIDDEN, HIDDEN), jnp.float32) * 0.02)
    binit = lambda k: (jax.random.normal(k, (1, HIDDEN), jnp.float32) * 0.02)
    return {
        "wq": init(ks[0]), "bq": binit(ks[1]),
        "wk": init(ks[2]), "bk": binit(ks[3]),
        "wv": init(ks[4]), "bv": binit(ks[5]),
        "wd": init(ks[6]), "bd": binit(ks[7]),
        "gamma": jnp.ones((1, HIDDEN), jnp.float32),
        "beta": jnp.zeros((1, HIDDEN), jnp.float32),
    }


if __name__ == "__main__":
    key = jax.random.PRNGKey(0)
    k_x, k_p = jax.random.split(key)

    x = jax.random.normal(k_x, (BATCH, SEQ, HIDDEN), jnp.float32)

    # Additive attention mask: batch 0 attends to all positions, batch 1 only
    # to the first 5 keys (masked keys get -10000.0, like BERT extended mask).
    lengths = jnp.array([SEQ, 5], dtype=jnp.int32)
    valid = (jnp.arange(SEQ)[None, :] < lengths[:, None]).astype(jnp.float32)
    mask = (1.0 - valid) * -10000.0  # (B, S)

    params = make_params(k_p)
    fused = prepare_params(params)   # one-time weight fusion / scale folding

    out = self_attention(x, mask, fused)
    out = jax.block_until_ready(out)

    ref = reference_forward(x, mask, params)
    # tolerance covers MXU f32 pass vs XLA default matmul precision differences
    # (softmax itself now uses an exact divide)
    np.testing.assert_allclose(np.asarray(out), np.asarray(ref), rtol=2e-3, atol=2e-3)

    print("KERNEL_OK")
</pallas_src>

<mosaic_0001>
module attributes {stable_mosaic.version = 11 : i64} {
  func.func @self_attention_kernel(%arg0: i32, %arg1: memref<16x32xf32, #tpu.memory_space<vmem>>, %arg2: memref<2x8xf32, #tpu.memory_space<vmem>>, %arg3: memref<32x96xf32, #tpu.memory_space<vmem>>, %arg4: memref<1x96xf32, #tpu.memory_space<vmem>>, %arg5: memref<32x32xf32, #tpu.memory_space<vmem>>, %arg6: memref<1x32xf32, #tpu.memory_space<vmem>>, %arg7: memref<1x32xf32, #tpu.memory_space<vmem>>, %arg8: memref<1x32xf32, #tpu.memory_space<vmem>>, %arg9: memref<16x32xf32, #tpu.memory_space<vmem>>) attributes {dimension_semantics = [#tpu.dimension_semantics<arbitrary>], iteration_bounds = array<i64: 1>, scalar_prefetch = 0 : i64, scratch_operands = 0 : i64, tpu.core_type = #tpu.core_type<tc>, window_params = [{pipeline_mode = #tpu.pipeline_mode<synchronous>, transform_indices = @transform_0, window_bounds = array<i64: 16, 32>}, {pipeline_mode = #tpu.pipeline_mode<synchronous>, transform_indices = @transform_1, window_bounds = array<i64: 2, 8>}, {pipeline_mode = #tpu.pipeline_mode<synchronous>, transform_indices = @transform_2, window_bounds = array<i64: 32, 96>}, {pipeline_mode = #tpu.pipeline_mode<synchronous>, transform_indices = @transform_3, window_bounds = array<i64: 1, 96>}, {pipeline_mode = #tpu.pipeline_mode<synchronous>, transform_indices = @transform_4, window_bounds = array<i64: 32, 32>}, {pipeline_mode = #tpu.pipeline_mode<synchronous>, transform_indices = @transform_5, window_bounds = array<i64: 1, 32>}, {pipeline_mode = #tpu.pipeline_mode<synchronous>, transform_indices = @transform_6, window_bounds = array<i64: 1, 32>}, {pipeline_mode = #tpu.pipeline_mode<synchronous>, transform_indices = @transform_7, window_bounds = array<i64: 1, 32>}, {pipeline_mode = #tpu.pipeline_mode<synchronous>, transform_indices = @transform_8, window_bounds = array<i64: 16, 32>}]} {
    %c0 = arith.constant 0 : index
    %c0_0 = arith.constant 0 : index
    %0 = vector.load %arg1[%c0, %c0_0] : memref<16x32xf32, #tpu.memory_space<vmem>>, vector<16x32xf32>
    %c0_1 = arith.constant 0 : index
    %c0_2 = arith.constant 0 : index
    %1 = vector.load %arg3[%c0_1, %c0_2] : memref<32x96xf32, #tpu.memory_space<vmem>>, vector<32x96xf32>
    %cst = arith.constant dense<0.000000e+00> : vector<16x96xf32>
    %2 = tpu.matmul %0, %1, %cst {dimension_numbers = #tpu.dot_dimension_numbers<[1], [0], [0], [1], [0, 0, 1, 1], [], []>} : vector<16x32xf32>, vector<32x96xf32>, vector<16x96xf32> -> vector<16x96xf32>
    %c0_3 = arith.constant 0 : index
    %c0_4 = arith.constant 0 : index
    %3 = vector.load %arg4[%c0_3, %c0_4] : memref<1x96xf32, #tpu.memory_space<vmem>>, vector<1x96xf32>
    %4 = vector.broadcast %3 : vector<1x96xf32> to vector<16x96xf32>
    %5 = arith.addf %2, %4 : vector<16x96xf32>
    %6 = vector.extract_strided_slice %5 {offsets = [0, 0], sizes = [16, 24], strides = [1, 1]} : vector<16x96xf32> to vector<16x24xf32>
    %7 = vector.shape_cast %6 : vector<16x24xf32> to vector<2x1x8x24xf32>
    %8 = vector.extract_strided_slice %5 {offsets = [0, 24], sizes = [16, 24], strides = [1, 1]} : vector<16x96xf32> to vector<16x24xf32>
    %9 = vector.shape_cast %8 : vector<16x24xf32> to vector<2x1x8x24xf32>
    %10 = vector.extract_strided_slice %5 {offsets = [0, 48], sizes = [16, 24], strides = [1, 1]} : vector<16x96xf32> to vector<16x24xf32>
    %11 = vector.shape_cast %10 : vector<16x24xf32> to vector<2x1x8x24xf32>
    %12 = vector.extract_strided_slice %5 {offsets = [0, 72], sizes = [16, 24], strides = [1, 1]} : vector<16x96xf32> to vector<16x24xf32>
    %13 = vector.shape_cast %12 : vector<16x24xf32> to vector<2x1x8x24xf32>
    %14 = tpu.concatenate %7, %9, %11, %13 in 1 : vector<2x1x8x24xf32>, vector<2x1x8x24xf32>, vector<2x1x8x24xf32>, vector<2x1x8x24xf32> -> vector<2x4x8x24xf32>
    %15 = vector.shape_cast %14 : vector<2x4x8x24xf32> to vector<8x8x24xf32>
    %16 = vector.extract_strided_slice %15 {offsets = [0, 0, 0], sizes = [8, 8, 8], strides = [1, 1, 1]} : vector<8x8x24xf32> to vector<8x8x8xf32>
    %17 = vector.extract_strided_slice %15 {offsets = [0, 0, 8], sizes = [8, 8, 8], strides = [1, 1, 1]} : vector<8x8x24xf32> to vector<8x8x8xf32>
    %18 = vector.extract_strided_slice %15 {offsets = [0, 0, 16], sizes = [8, 8, 8], strides = [1, 1, 1]} : vector<8x8x24xf32> to vector<8x8x8xf32>
    %c0_5 = arith.constant 0 : index
    %c0_6 = arith.constant 0 : index
    %19 = vector.load %arg2[%c0_5, %c0_6] : memref<2x8xf32, #tpu.memory_space<vmem>>, vector<2x8xf32>
    %20 = vector.shape_cast %19 : vector<2x8xf32> to vector<2x1x1x8xf32>
    %21 = vector.shape_cast %20 : vector<2x1x1x8xf32> to vector<2x1x1x8xf32>
    %22 = vector.broadcast %21 : vector<2x1x1x8xf32> to vector<2x4x1x8xf32>
    %23 = vector.shape_cast %22 : vector<2x4x1x8xf32> to vector<8x1x8xf32>
    "tpu.trace_start"() <{level = 10 : i32, message = "bqd,bkd->bqk"}> : () -> ()
    %cst_7 = arith.constant dense<0.000000e+00> : vector<8x8x8xf32>
    %24 = tpu.matmul %16, %17, %cst_7 {dimension_numbers = #tpu.dot_dimension_numbers<[2], [2], [1], [1], [0, 0, 0, 1, 1, 1], [0], [0]>} : vector<8x8x8xf32>, vector<8x8x8xf32>, vector<8x8x8xf32> -> vector<8x8x8xf32>
    "tpu.trace_stop"() : () -> ()
    %25 = vector.broadcast %23 : vector<8x1x8xf32> to vector<8x8x8xf32>
    %26 = arith.addf %24, %25 : vector<8x8x8xf32>
    %cst_8 = arith.constant dense<0xFF800000> : vector<8x8xf32>
    %27 = vector.multi_reduction <maximumf>, %26, %cst_8 [2] : vector<8x8x8xf32> to vector<8x8xf32>
    %28 = vector.shape_cast %27 : vector<8x8xf32> to vector<8x8x1xf32>
    %29 = vector.broadcast %28 : vector<8x8x1xf32> to vector<8x8x8xf32>
    %30 = arith.subf %26, %29 : vector<8x8x8xf32>
    %31 = math.exp %30 : vector<8x8x8xf32>
    %cst_9 = arith.constant dense<0.000000e+00> : vector<8x8xf32>
    %32 = vector.multi_reduction <add>, %31, %cst_9 [2] : vector<8x8x8xf32> to vector<8x8xf32>
    %33 = vector.shape_cast %32 : vector<8x8xf32> to vector<8x8x1xf32>
    %34 = vector.broadcast %33 : vector<8x8x1xf32> to vector<8x8x8xf32>
    %35 = arith.divf %31, %34 : vector<8x8x8xf32>
    "tpu.trace_start"() <{level = 10 : i32, message = "bqk,bkd->bqd"}> : () -> ()
    %cst_10 = arith.constant dense<0.000000e+00> : vector<8x8x8xf32>
    %36 = tpu.matmul %35, %18, %cst_10 {dimension_numbers = #tpu.dot_dimension_numbers<[2], [1], [1], [2], [0, 0, 0, 1, 1, 2], [0], [0]>} : vector<8x8x8xf32>, vector<8x8x8xf32>, vector<8x8x8xf32> -> vector<8x8x8xf32>
    "tpu.trace_stop"() : () -> ()
    %37 = vector.shape_cast %36 : vector<8x8x8xf32> to vector<2x4x8x8xf32>
    %38 = vector.extract_strided_slice %37 {offsets = [0, 0, 0, 0], sizes = [2, 1, 8, 8], strides = [1, 1, 1, 1]} : vector<2x4x8x8xf32> to vector<2x1x8x8xf32>
    %39 = vector.shape_cast %38 : vector<2x1x8x8xf32> to vector<2x8x8xf32>
    %40 = vector.extract_strided_slice %37 {offsets = [0, 1, 0, 0], sizes = [2, 1, 8, 8], strides = [1, 1, 1, 1]} : vector<2x4x8x8xf32> to vector<2x1x8x8xf32>
    %41 = vector.shape_cast %40 : vector<2x1x8x8xf32> to vector<2x8x8xf32>
    %42 = vector.extract_strided_slice %37 {offsets = [0, 2, 0, 0], sizes = [2, 1, 8, 8], strides = [1, 1, 1, 1]} : vector<2x4x8x8xf32> to vector<2x1x8x8xf32>
    %43 = vector.shape_cast %42 : vector<2x1x8x8xf32> to vector<2x8x8xf32>
    %44 = vector.extract_strided_slice %37 {offsets = [0, 3, 0, 0], sizes = [2, 1, 8, 8], strides = [1, 1, 1, 1]} : vector<2x4x8x8xf32> to vector<2x1x8x8xf32>
    %45 = vector.shape_cast %44 : vector<2x1x8x8xf32> to vector<2x8x8xf32>
    %46 = tpu.concatenate %39, %41, %43, %45 in 2 : vector<2x8x8xf32>, vector<2x8x8xf32>, vector<2x8x8xf32>, vector<2x8x8xf32> -> vector<2x8x32xf32>
    %47 = vector.shape_cast %46 : vector<2x8x32xf32> to vector<16x32xf32>
    %c0_11 = arith.constant 0 : index
    %c0_12 = arith.constant 0 : index
    %48 = vector.load %arg5[%c0_11, %c0_12] : memref<32x32xf32, #tpu.memory_space<vmem>>, vector<32x32xf32>
    %cst_13 = arith.constant dense<0.000000e+00> : vector<16x32xf32>
    %49 = tpu.matmul %47, %48, %cst_13 {dimension_numbers = #tpu.dot_dimension_numbers<[1], [0], [0], [1], [0, 0, 1, 1], [], []>} : vector<16x32xf32>, vector<32x32xf32>, vector<16x32xf32> -> vector<16x32xf32>
    %c0_14 = arith.constant 0 : index
    %c0_15 = arith.constant 0 : index
    %50 = vector.load %arg6[%c0_14, %c0_15] : memref<1x32xf32, #tpu.memory_space<vmem>>, vector<1x32xf32>
    %51 = vector.broadcast %50 : vector<1x32xf32> to vector<16x32xf32>
    %52 = arith.addf %49, %51 : vector<16x32xf32>
    %53 = arith.addf %52, %0 : vector<16x32xf32>
    %cst_16 = arith.constant dense<0.000000e+00> : vector<16xf32>
    %54 = vector.multi_reduction <add>, %53, %cst_16 [1] : vector<16x32xf32> to vector<16xf32>
    %55 = vector.shape_cast %54 : vector<16xf32> to vector<16x1xf32>
    %cst_17 = arith.constant 3.200000e+01 : f32
    %56 = vector.broadcast %cst_17 : f32 to vector<16x1xf32>
    %57 = arith.divf %55, %56 : vector<16x1xf32>
    %58 = vector.broadcast %57 : vector<16x1xf32> to vector<16x32xf32>
    %59 = arith.subf %53, %58 : vector<16x32xf32>
    %60 = arith.mulf %59, %59 : vector<16x32xf32>
    %cst_18 = arith.constant dense<0.000000e+00> : vector<16xf32>
    %61 = vector.multi_reduction <add>, %60, %cst_18 [1] : vector<16x32xf32> to vector<16xf32>
    %62 = vector.shape_cast %61 : vector<16xf32> to vector<16x1xf32>
    %cst_19 = arith.constant 3.200000e+01 : f32
    %63 = vector.broadcast %cst_19 : f32 to vector<16x1xf32>
    %64 = arith.divf %62, %63 : vector<16x1xf32>
    %cst_20 = arith.constant 9.99999996E-13 : f32
    %65 = vector.broadcast %cst_20 : f32 to vector<16x1xf32>
    %66 = arith.addf %64, %65 : vector<16x1xf32>
    %67 = math.rsqrt %66 : vector<16x1xf32>
    %68 = vector.broadcast %67 : vector<16x1xf32> to vector<16x32xf32>
    %69 = arith.mulf %59, %68 : vector<16x32xf32>
    %c0_21 = arith.constant 0 : index
    %c0_22 = arith.constant 0 : index
    %70 = vector.load %arg7[%c0_21, %c0_22] : memref<1x32xf32, #tpu.memory_space<vmem>>, vector<1x32xf32>
    %71 = vector.broadcast %70 : vector<1x32xf32> to vector<16x32xf32>
    %72 = arith.mulf %71, %69 : vector<16x32xf32>
    %c0_23 = arith.constant 0 : index
    %c0_24 = arith.constant 0 : index
    %73 = vector.load %arg8[%c0_23, %c0_24] : memref<1x32xf32, #tpu.memory_space<vmem>>, vector<1x32xf32>
    %74 = vector.broadcast %73 : vector<1x32xf32> to vector<16x32xf32>
    %75 = arith.addf %72, %74 : vector<16x32xf32>
    %c0_25 = arith.constant 0 : index
    %c0_26 = arith.constant 0 : index
    %76 = vector.load %arg9[%c0_25, %c0_26] : memref<16x32xf32, #tpu.memory_space<vmem>>, vector<16x32xf32>
    tpu.vector_store %arg9[%c0_25, %c0_26], %75 {strides = array<i32>} : memref<16x32xf32, #tpu.memory_space<vmem>>, vector<16x32xf32>,
    return
  }
  func.func @transform_0(%arg0: i32) -> (i32, i32) {
    %c0_i32 = arith.constant 0 : i32
    %c0_i32_0 = arith.constant 0 : i32
    %c0_i32_1 = arith.constant 0 : i32
    return %c0_i32, %c0_i32_0 : i32, i32
  }
  func.func @transform_1(%arg0: i32) -> (i32, i32) {
    %c0_i32 = arith.constant 0 : i32
    %c0_i32_0 = arith.constant 0 : i32
    %c0_i32_1 = arith.constant 0 : i32
    return %c0_i32, %c0_i32_0 : i32, i32
  }
  func.func @transform_2(%arg0: i32) -> (i32, i32) {
    %c0_i32 = arith.constant 0 : i32
    %c0_i32_0 = arith.constant 0 : i32
    %c0_i32_1 = arith.constant 0 : i32
    return %c0_i32, %c0_i32_0 : i32, i32
  }
  func.func @transform_3(%arg0: i32) -> (i32, i32) {
    %c0_i32 = arith.constant 0 : i32
    %c0_i32_0 = arith.constant 0 : i32
    %c0_i32_1 = arith.constant 0 : i32
    return %c0_i32, %c0_i32_0 : i32, i32
  }
  func.func @transform_4(%arg0: i32) -> (i32, i32) {
    %c0_i32 = arith.constant 0 : i32
    %c0_i32_0 = arith.constant 0 : i32
    %c0_i32_1 = arith.constant 0 : i32
    return %c0_i32, %c0_i32_0 : i32, i32
  }
  func.func @transform_5(%arg0: i32) -> (i32, i32) {
    %c0_i32 = arith.constant 0 : i32
    %c0_i32_0 = arith.constant 0 : i32
    %c0_i32_1 = arith.constant 0 : i32
    return %c0_i32, %c0_i32_0 : i32, i32
  }
  func.func @transform_6(%arg0: i32) -> (i32, i32) {
    %c0_i32 = arith.constant 0 : i32
    %c0_i32_0 = arith.constant 0 : i32
    %c0_i32_1 = arith.constant 0 : i32
    return %c0_i32, %c0_i32_0 : i32, i32
  }
  func.func @transform_7(%arg0: i32) -> (i32, i32) {
    %c0_i32 = arith.constant 0 : i32
    %c0_i32_0 = arith.constant 0 : i32
    %c0_i32_1 = arith.constant 0 : i32
    return %c0_i32, %c0_i32_0 : i32, i32
  }
  func.func @transform_8(%arg0: i32) -> (i32, i32) {
    %c0_i32 = arith.constant 0 : i32
    %c0_i32_0 = arith.constant 0 : i32
    %c0_i32_1 = arith.constant 0 : i32
    return %c0_i32, %c0_i32_0 : i32, i32
  }
}

</mosaic_0001>

<bundles_post_ra>
// kernel: tpu_custom_call.1
= control target key start
LH: loop header
LB: loop body
LE: loop exit
PB: predicated region body
PF: predicated region fallthrough
CT: control target
= control target key end

     0   :  { %13 = vsyncpa [#allocation3], 0  ;;  %s2340_s0 = inlined_call_operand.hbm [shape: f32[16,32], index: 0, kind: input, shape index: {}]   ;;  %s2341_s1 = inlined_call_operand.hbm [shape: f32[2,8], index: 1, kind: input, shape index: {}]   ;;  %s2342_s2 = inlined_call_operand.hbm [shape: f32[32,96], index: 2, kind: input, shape index: {}]   ;;  %s2343_s3 = inlined_call_operand.vmem [shape: f32[1,96], index: 3, kind: input, shape index: {}]   ;;  %s2344_s4 = inlined_call_operand.hbm [shape: f32[32,32], index: 4, kind: input, shape index: {}]   ;;  %s2345_s5 = inlined_call_operand.vmem [shape: f32[1,32], index: 5, kind: input, shape index: {}]   ;;  %s2346_s6 = inlined_call_operand.vmem [shape: f32[1,32], index: 6, kind: input, shape index: {}]   ;;  %s2347_s7 = inlined_call_operand.vmem [shape: f32[1,32], index: 7, kind: input, shape index: {}]   ;;  %s2348_s8 = inlined_call_operand.hbm [shape: f32[16,32], index: 8, kind: output, shape index: {}]  }
   0x1   :  { %14 = vsyncpa [#allocation6], 0 }
   0x2   :  { %15 = vsyncpa [#allocation9], 0 }
   0x3   :  { %16 = vsyncpa [#allocation4], 0  ;;  %s2063_s27 = smov [#allocation5]   ;;  %s2064_s29 = smov [#allocation2]  }
   0x4   :  { %s35_s28 = sshll.u32 %s2063_s27, 4  ;;  %s22_s30 = sshll.u32 %s2064_s29, 4  ;;  %s36_s28 = int_to_ptr.vmem [resolvable:$true] %s35_s28  ;;  %s23_s30 = int_to_ptr.vmem [resolvable:$true] %s22_s30 }
   0x5   :  { %s1963_s9 = scalar_lea.vmem %s36_s28, 32  ;;  %p1968_p1 = scmp.lt.s32.totalorder %s36_s28, %s36_s28 }
   0x6   :  { %p1964_p0 = scmp.ne.s32.totalorder %s36_s28, %s1963_s9  ;;  %p1969_p2 = scmp.lt.s32.totalorder %s1963_s9, %s1963_s9 }
   0x8   :  { %p1970_p3 = por %p1969_p2, %p1968_p1 }
   0xa   :  { %p1971_p4 = pnand %p1970_p3, %p1964_p0 }
   0xc   :  { %1974 = shalt.err (!%p1971_p4)
}
   0xd   :  { %38 = dma.hbm_to_vmem [thread:$0]  %s2341_s1, 32, %s36_s28, [#allocation6]  }
   0xe   :  { %s1983_s12 = scalar_lea.vmem %s23_s30, 256  ;;  %p1988_p6 = scmp.lt.s32.totalorder %s23_s30, %s23_s30 }
   0xf   :  { %p1984_p5 = scmp.ne.s32.totalorder %s23_s30, %s1983_s12  ;;  %p1989_p7 = scmp.lt.s32.totalorder %s1983_s12, %s1983_s12 }
  0x11   :  { %p1990_p8 = por %p1989_p7, %p1988_p6 }
  0x13   :  { %p1991_p9 = pnand %p1990_p8, %p1984_p5 }
  0x15   :  { %1994 = shalt.err (!%p1991_p9)
}
  0x16   :  { %s2065_s13 = smov 128   ;;  %s2066_s14 = smov 8  }
  0x17   :  { %28 = dma.hbm_to_vmem [thread:$0]  %s2340_s0, 256, %s23_s30, [#allocation3], %s2065_s13, %s2065_s13, %s2066_s14  }
  0x18   :  { %s2067_s17 = smov [#allocation7]   ;;  %s2068_s19 = smov [#allocation8]  }
  0x19   :  { %s44_s18 = sshll.u32 %s2067_s17, 4  ;;  %s58_s1 = sshll.u32 %s2068_s19, 4  ;;  %s45_s18 = int_to_ptr.vmem [resolvable:$true] %s44_s18  ;;  %s59_s1 = int_to_ptr.vmem [resolvable:$true] %s58_s1 }
  0x1a   :  { %s2003_s20 = scalar_lea.vmem %s45_s18, 512  ;;  %p2008_p11 = scmp.lt.s32.totalorder %s45_s18, %s45_s18 }
  0x1b   :  { %p2004_p10 = scmp.ne.s32.totalorder %s45_s18, %s2003_s20  ;;  %p2009_p12 = scmp.lt.s32.totalorder %s2003_s20, %s2003_s20 }
  0x1d   :  { %p2010_p13 = por %p2009_p12, %p2008_p11 }
  0x1f   :  { %p2011_p0 = pnand %p2010_p13, %p2004_p10 }
  0x21   :  { %2014 = shalt.err (!%p2011_p0)
}
  0x22   :  { %50 = dma.hbm_to_vmem [thread:$0]  %s2342_s2, 512, %s45_s18, [#allocation6], %s2065_s13, %s2065_s13, %s2066_s14  }
  0x23   :  { %s2023_s0 = scalar_lea.vmem %s59_s1, 512  ;;  %p2028_p2 = scmp.lt.s32.totalorder %s59_s1, %s59_s1 }
  0x24   :  { %p2024_p1 = scmp.ne.s32.totalorder %s59_s1, %s2023_s0  ;;  %p2029_p3 = scmp.lt.s32.totalorder %s2023_s0, %s2023_s0 }
  0x26   :  { %p2030_p4 = por %p2029_p3, %p2028_p2 }
  0x28   :  { %p2031_p5 = pnand %p2030_p4, %p2024_p1 }
  0x2a   :  { %2034 = shalt.err (!%p2031_p5)
}
  0x2b   :  { %64 = dma.hbm_to_vmem [thread:$0]  %s2344_s4, 512, %s59_s1, [#allocation9], %s2065_s13, %s2065_s13, %s2066_s14  }
  0x2c   :  { %2055 = dma.done.wait [#allocation3], 256  }
  0x2d   :  { %2056 = vsyncadd [#allocation3], 4294967040 }
  0x2e   :  { %2057 = dma.done.wait [#allocation6], 544  }
  0x2f   :  { %2058 = vsyncadd [#allocation6], 4294966752 }
  0x30   :  { %2059 = dma.done.wait [#allocation9], 512  }
  0x31   :  { %2060 = vsyncadd [#allocation9], 4294966784  ;;  %vm96_vm0 = vcmask 261120   ;;  %v88_v0 = vld [vmem:[#allocation7 + $0x18] sm:$0xff]  ;;  %v87_v1 = vld [vmem:[#allocation7 + $0x10] sm:$0xff]  ;;  %v2069_v7 = vmov 0.0   ;;  %v205_v28 = vlaneseq }
  0x32   :  { %1800 = vmatprep.subr.mxu0 %v88_v0  ;;  %v2146_v2 = vld [vmem:[#allocation2] sm:$0xff]  ;;  %v85_v4 = vld [vmem:[#allocation7] sm:$0xff]  ;;  %v2150_v5 = vld [vmem:[#allocation2 + $0x8] sm:$0xff]  ;;  %1811 = vmatprep.subr.mxu1 %v2069_v7  ;;  %s2070_s25 = smov 56   ;;  %s2071_s26 = smov 104   ;;  %vm2072_vm1 = vmmov 0  }
  0x33   :  { %1801 = vmatpush3.msra.mxu0 %v88_v0  ;;  %v86_v3 = vld [vmem:[#allocation7 + $0x8] sm:$0xff]  ;;  %1808 = vmatprep.mubr.msk.f32.mxu0 %vm96_vm0, %v2146_v2  ;;  %s2074_s27 = smov 120   ;;  %vm228_vm2 = vcmask 64512   ;;  %v2075_v26 = vmov 1966171168   ;;  %v206_v30 = vshrl.u32 %v205_v28, 7 }
  0x34   :  { %1802 = vmatprep.subr.mxu0 %v87_v1  ;;  %v1723_v8 = vld [vmem:[%s2343_s3] ss:$0 sm:$0xff]  ;;  %1813 = vmatprep.mubr.msk.f32.mxu1 %vm2072_vm1, %v2069_v7  ;;  %s2073_s3 = smov 80   ;;  %v203_v27 = vunpack.c.l.s4 %v2075_v26  ;;  %s2076_s28 = smov 112   ;;  %vm1557_vm3 = vcmask 130048   ;;  %vm1560_vm4 = vcmask 195584  }
  0x35   :  { %1803 = vmatpush3.msra.mxu0 %v87_v1  ;;  %v1726_v32 = vld.sshfl [vmem:[#allocation5] sm:$0x11 pattern:$0x75316420]  ;;  %v218_v34 = vsub.s32 0, %v206_v30  ;;  %s2077_s29 = smov 16  }
  0x36   :  { %1804 = vmatprep.subr.mxu0 %v86_v3  ;;  %v204_v29 = vunpack.c.0.s8 %v203_v27  ;;  %v201_v40 = vcombine.high %v1726_v32, %v1726_v32  ;;  %s2078_s30 = smov 24   ;;  %s2079_s16 = smov [#allocation10]  }
  0x37   :  { %1805 = vmatpush3.msra.mxu0 %v86_v3  ;;  %s1709_s17 = sshll.u32 %s2079_s16, 4  ;;  %s1710_s17 = int_to_ptr.vmem [resolvable:$true] %s1709_s17 }
  0x38   :  { %1806 = vmatprep.subr.mxu0 %v85_v4  ;;  %v207_v31 = vsub.s32 %v204_v29, %v206_v30  ;;  %s2035_s18 = scalar_lea.vmem %s1710_s17, 256  ;;  %p2040_p7 = scmp.lt.s32.totalorder %s1710_s17, %s1710_s17 }
  0x39   :  { %1807 = vmatpush3.msra.mxu0 %v85_v4  ;;  %p2036_p6 = scmp.ne.s32.totalorder %s1710_s17, %s2035_s18  ;;  %p2041_p8 = scmp.lt.s32.totalorder %s2035_s18, %s2035_s18 }
  0x3a   :  { %1809 = vmatmul.mubr.msk.f32.vlgmr.msra.gmra.mxu0 %vm96_vm0, %v2150_v5  ;;  %1831 = vmatprep.subr.mxu0 %v2069_v7  ;;  %v208_v33 = vrot.slane %v1726_v32, %v207_v31  ;;  %v215_v43 = vrot.slane %v201_v40, %v207_v31 }
  0x3b   :  { %1833 = vmatprep.mubr.msk.f32.mxu0 %vm2072_vm1, %v2069_v7  ;;  %p2042_p9 = por %p2041_p8, %p2040_p7 }
  0x3c   :  { %v219_v35 = vrot.slane %v208_v33, %v218_v34  ;;  %v223_v48 = vrot.slane %v215_v43, %v218_v34 }
  0x3d   :  { %p2043_p10 = pnand %p2042_p9, %p2036_p6 }
  0xfa   :  { %v1810_v6 = vpop.f32.mrf.mxu0 }
  0xfb   :  { %v2167_v11 = vadd.f32 %v1810_v6, %v1723_v8 }
  0xfc   :  { %v169_v9 = vpop.f32.mrf.mxu0 }
  0xfd   :  { %v2159_v10 = vadd.f32 %v1723_v8, %v169_v9 }
  0xff   :  { %188 = vrot.lane.b32.xlu1 %v2159_v10, %s2070_s25  ;;  %180 = vrot.lane.b32.xlu0 %v2159_v10, %s2071_s26 }
 0x103   :  { %182 = vrot.lane.b32.xlu1 %v2167_v11, %s2071_s26  ;;  %184 = vrot.lane.b32.xlu0 %v2159_v10, %s2073_s3 }
 0x107   :  { %190 = vrot.lane.b32.xlu1 %v2167_v11, %s2070_s25  ;;  %186 = vrot.lane.b32.xlu0 %v2167_v11, %s2073_s3 }
 0x10b   :  { %226 = vrot.lane.b32.xlu0 %v2159_v10, %s2074_s27 }
 0x171   :  { %v2174_v12 = vpop.permute.xlu1 %188  ;;  %v2176_v13 = vpop.permute.xlu0 %180 }
 0x172   :  { %303 = vrot.lane.b32.xlu1 %v2176_v13, %s2074_s27 }
 0x175   :  { %v2179_v14 = vpop.permute.xlu0 %184  ;;  %v2183_v15 = vpop.permute.xlu1 %182 }
 0x176   :  { %455 = vrot.lane.b32.xlu1 %v2174_v12, %s2074_s27  ;;  %379 = vrot.lane.b32.xlu0 %v2179_v14, %s2074_s27 }
 0x179   :  { %v2185_v16 = vpop.permute.xlu0 %186  ;;  %v2189_v17 = vpop.permute.xlu1 %190 }
 0x17a   :  { %607 = vrot.lane.b32.xlu1 %v2183_v15, %s2074_s27  ;;  %531 = vrot.lane.b32.xlu0 %v2167_v11, %s2074_s27 }
 0x17d   :  { %v227_v18 = vpop.permute.xlu0 %226 }
 0x17e   :  { %759 = vrot.lane.b32.xlu1 %v2189_v17, %s2074_s27  ;;  %683 = vrot.lane.b32.xlu0 %v2185_v16, %s2074_s27 }
 0x17f   :  { %1812 = vmatpush3.xpose.msk.msra.mxu1 %vm228_vm2, %v227_v18 }
 0x180   :  { %1816 = vmatprep.subr.mxu1 %v2069_v7 }
 0x182   :  { %1814 = vmatmul.mubr.msk.f32.vlgmr.msra.gmra.mxu1 %vm228_vm2, %v2159_v10 }
 0x183   :  { %1818 = vmatprep.mubr.msk.f32.mxu1 %vm2072_vm1, %v2069_v7 }
 0x1e4   :  { %v304_v19 = vpop.permute.xlu1 %303 }
 0x1e5   :  { %1817 = vmatpush3.xpose.msk.msra.mxu1 %vm228_vm2, %v304_v19 }
 0x1e6   :  { %1821 = vmatprep.subr.mxu1 %v2069_v7 }
 0x1e8   :  { %v456_v20 = vpop.permute.xlu1 %455  ;;  %1819 = vmatmul.mubr.msk.f32.vlgmr.msra.gmra.mxu1 %vm228_vm2, %v2176_v13  ;;  %v380_v21 = vpop.permute.xlu0 %379 }
 0x1e9   :  { %1822 = vmatpush3.xpose.msk.msra.mxu1 %vm228_vm2, %v380_v21  ;;  %1823 = vmatprep.mubr.msk.f32.mxu1 %vm2072_vm1, %v2069_v7 }
 0x1ea   :  { %1826 = vmatprep.subr.mxu1 %v2069_v7 }
 0x1ec   :  { %1824 = vmatmul.mubr.msk.f32.vlgmr.msra.gmra.mxu1 %vm228_vm2, %v2179_v14  ;;  %v532_v22 = vpop.permute.xlu0 %531  ;;  %v608_v23 = vpop.permute.xlu1 %607 }
 0x1ed   :  { %1827 = vmatpush3.xpose.msk.msra.mxu1 %vm228_vm2, %v456_v20  ;;  %1832 = vmatpush3.xpose.msk.msra.mxu0 %vm228_vm2, %v532_v22 }
 0x1ee   :  { %1828 = vmatprep.mubr.msk.f32.mxu1 %vm2072_vm1, %v2069_v7  ;;  %1836 = vmatprep.subr.mxu1 %v2069_v7 }
 0x1ef   :  { %1841 = vmatprep.subr.mxu0 %v2069_v7 }
 0x1f0   :  { %1829 = vmatmul.mubr.msk.f32.vlgmr.msra.gmra.mxu1 %vm228_vm2, %v2174_v12  ;;  %1834 = vmatmul.mubr.msk.f32.vlgmr.msra.gmra.mxu0 %vm228_vm2, %v2167_v11  ;;  %v684_v24 = vpop.permute.xlu0 %683  ;;  %v760_v25 = vpop.permute.xlu1 %759 }
 0x1f1   :  { %1837 = vmatpush3.xpose.msk.msra.mxu1 %vm228_vm2, %v608_v23  ;;  %1842 = vmatpush3.xpose.msk.msra.mxu0 %vm228_vm2, %v684_v24 }
 0x1f2   :  { %1838 = vmatprep.mubr.msk.f32.mxu1 %vm2072_vm1, %v2069_v7  ;;  %1843 = vmatprep.mubr.msk.f32.mxu0 %vm2072_vm1, %v2069_v7 }
 0x1f3   :  { %1846 = vmatprep.subr.mxu1 %v2069_v7  ;;  %1851 = vmatprep.subr.mxu0 %v2069_v7 }
 0x1f4   :  { %1839 = vmatmul.mubr.msk.f32.vlgmr.msra.gmra.mxu1 %vm228_vm2, %v2183_v15  ;;  %1844 = vmatmul.mubr.msk.f32.vlgmr.msra.gmra.mxu0 %vm228_vm2, %v2185_v16 }
 0x1f5   :  { %1847 = vmatpush3.xpose.msk.msra.mxu1 %vm228_vm2, %v760_v25  ;;  %1848 = vmatprep.mubr.msk.f32.mxu1 %vm2072_vm1, %v2069_v7 }
 0x1f6   :  { %1856 = vmatprep.subr.mxu1 %v2069_v7  ;;  %1853 = vmatprep.mubr.msk.f32.mxu0 %vm2072_vm1, %v2069_v7 }
 0x1f8   :  { %1849 = vmatmul.mubr.msk.f32.vlgmr.msra.gmra.mxu1 %vm228_vm2, %v2189_v17 }
 0x1f9   :  { %1858 = vmatprep.mubr.msk.f32.mxu1 %vm2072_vm1, %v2069_v7 }
 0x242   :  { %v299_v36 = vpop.f32.mrf.mxu1 }
 0x243   :  { %v300_v37 = vadd.f32 %v299_v36, %v219_v35 }
 0x244   :  { %v1815_v38 = vpop.f32.mrf.mxu1 }
 0x245   :  { %v835_v39 = vsel %vm228_vm2, %v300_v37, -inf }
 0x246   :  { %836 = vmax.xlane.f32.xlu0 %v835_v39 }
 0x2a8   :  { %v375_v41 = vpop.f32.mrf.mxu1 }
 0x2a9   :  { %v376_v42 = vadd.f32 %v375_v41, %v219_v35 }
 0x2aa   :  { %v1820_v44 = vpop.f32.mrf.mxu1 }
 0x2ab   :  { %v838_v45 = vsel %vm228_vm2, %v376_v42, -inf }
 0x2ac   :  { %839 = vmax.xlane.f32.xlu1 %v838_v45  ;;  %v451_v46 = vpop.f32.mrf.mxu1 }
 0x2ad   :  { %v2243_v47 = vadd.f32 %v451_v46, %v219_v35 }
 0x2ae   :  { %v1825_v49 = vpop.f32.mrf.mxu1 }
 0x2af   :  { %v841_v50 = vsel %vm228_vm2, %v2243_v47, -inf }
 0x2b0   :  { %842 = vmax.xlane.f32.xlu0 %v841_v50  ;;  %v527_v51 = vpop.f32.mrf.mxu1  ;;  %v603_v52 = vpop.f32.mrf.mxu0 }
 0x2b1   :  { %v528_v53 = vadd.f32 %v527_v51, %v219_v35  ;;  %v604_v54 = vadd.f32 %v603_v52, %v223_v48 }
 0x2b2   :  { %v1830_v55 = vpop.f32.mrf.mxu1  ;;  %v1835_v56 = vpop.f32.mrf.mxu0 }
 0x2b3   :  { %v844_v57 = vsel %vm228_vm2, %v528_v53, -inf  ;;  %v847_v58 = vsel %vm228_vm2, %v604_v54, -inf }
 0x2b4   :  { %845 = vmax.xlane.f32.xlu0 %v844_v57  ;;  %v679_v59 = vpop.f32.mrf.mxu1  ;;  %848 = vmax.xlane.f32.xlu1 %v847_v58  ;;  %v755_v60 = vpop.f32.mrf.mxu0 }
 0x2b5   :  { %v680_v61 = vadd.f32 %v679_v59, %v223_v48  ;;  %v756_v62 = vadd.f32 %v755_v60, %v223_v48 }
 0x2b6   :  { %v1840_v63 = vpop.f32.mrf.mxu1  ;;  %v1845_v0 = vpop.f32.mrf.mxu0 }
 0x2b7   :  { %v850_v1 = vsel %vm228_vm2, %v680_v61, -inf  ;;  %v853_v3 = vsel %vm228_vm2, %v756_v62, -inf }
 0x2b8   :  { %851 = vmax.xlane.f32.xlu0 %v850_v1  ;;  %v831_v4 = vpop.f32.mrf.mxu1  ;;  %854 = vmax.xlane.f32.xlu1 %v853_v3 }
 0x2b9   :  { %v832_v6 = vadd.f32 %v831_v4, %v223_v48 }
 0x2ba   :  { %v1850_v8 = vpop.f32.mrf.mxu1 }
 0x2bb   :  { %v856_v9 = vsel %vm228_vm2, %v832_v6, -inf }
 0x2bc   :  { %857 = vmax.xlane.f32.xlu0 %v856_v9 }
 0x2c9   :  { %923 = vrot.lane.b32.xlu1 %v2159_v10, %s2076_s28 }
 0x2cd   :  { %1075 = vrot.lane.b32.xlu1 %v2179_v14, %s2076_s28 }
 0x2cf   :  { %v837_v18 = vpop.xlane.xlu0 %836 }
 0x2d0   :  { %v859_v22 = vsub.f32 %v300_v37, %v837_v18 }
 0x2d1   :  { %1151 = vrot.lane.b32.xlu1 %v2174_v12, %s2076_s28 }
 0x2d2   :  { %999 = vrot.lane.b32.xlu0 %v2176_v13, %s2076_s28  ;;  %v867_v25 = vmul.f32 1.442695, %v859_v22 }
 0x2d5   :  { %1303 = vrot.lane.b32.xlu1 %v2183_v15, %s2076_s28 }
 0x2d6   :  { %1227 = vrot.lane.b32.xlu0 %v2167_v11, %s2076_s28 }
 0x335   :  { %v840_v19 = vpop.xlane.xlu1 %839 }
 0x336   :  { %v860_v20 = vsub.f32 %v376_v42, %v840_v19 }
 0x338   :  { %v869_v21 = vmul.f32 1.442695, %v860_v20 }
 0x339   :  { %v843_v10 = vpop.xlane.xlu0 %842 }
 0x33a   :  { %1919 = vpow2.f32 %v869_v21  ;;  %v861_v11 = vsub.f32 %v2243_v47, %v843_v10 }
 0x33c   :  { %v871_v36 = vmul.f32 1.442695, %v861_v11 }
 0x33d   :  { %v849_v14 = vpop.xlane.xlu1 %848  ;;  %v846_v23 = vpop.xlane.xlu0 %845 }
 0x33e   :  { %v863_v24 = vsub.f32 %v604_v54, %v849_v14  ;;  %v862_v12 = vsub.f32 %v528_v53, %v846_v23 }
 0x340   :  { %v875_v26 = vmul.f32 1.442695, %v863_v24  ;;  %v873_v13 = vmul.f32 1.442695, %v862_v12 }
 0x341   :  { %v855_v27 = vpop.xlane.xlu1 %854  ;;  %v852_v28 = vpop.xlane.xlu0 %851 }
 0x342   :  { %1921 = vpow2.f32 %v875_v26  ;;  %v865_v15 = vsub.f32 %v756_v62, %v855_v27  ;;  %v864_v29 = vsub.f32 %v680_v61, %v852_v28 }
 0x343   :  { %1923 = vpow2.f32 %v873_v13 }
 0x344   :  { %1925 = vpow2.f32 %v867_v25  ;;  %v879_v30 = vmul.f32 1.442695, %v865_v15  ;;  %v877_v31 = vmul.f32 1.442695, %v864_v29  ;;  %v1566_v29 = vld [vmem:[#allocation8 + $0x18] sm:$0xff] }
 0x345   :  { %v924_v32 = vpop.permute.xlu1 %923  ;;  %v858_v33 = vpop.xlane.xlu0 %857 }
 0x346   :  { %v866_v34 = vsub.f32 %v832_v6, %v858_v33  ;;  %1852 = vmatpush3.msra.mxu0 %v924_v32  ;;  %1927 = vpow2.f32 %v877_v31  ;;  %v1564_v32 = vld [vmem:[#allocation8 + $0x8] sm:$0xff]  ;;  %v1563_v33 = vld [vmem:[#allocation8] sm:$0xff] }
 0x347   :  { %v1920_v35 = vpop.eup %1919  ;;  %1861 = vmatprep.subr.mxu0 %v2069_v7  ;;  %1929 = vpow2.f32 %v879_v30  ;;  %v1565_v30 = vld [vmem:[#allocation8 + $0x10] sm:$0xff] }
 0x348   :  { %v881_v37 = vmul.f32 1.442695, %v866_v34  ;;  %v886_v38 = vsel %vm228_vm2, %v1920_v35, 0.0 }
 0x349   :  { %887 = vadd.xlane.f32.xlu0 %v886_v38  ;;  %v1000_v39 = vpop.permute.xlu0 %999  ;;  %v1076_v54 = vpop.permute.xlu1 %1075 }
 0x34a   :  { %1931 = vpow2.f32 %v881_v37  ;;  %1857 = vmatpush3.msra.mxu1 %v1000_v39 }
 0x34b   :  { %1866 = vmatprep.subr.mxu1 %v2069_v7  ;;  %1933 = vpow2.f32 %v871_v36 }
 0x34d   :  { %v1228_v55 = vpop.permute.xlu0 %1227  ;;  %v1152_v56 = vpop.permute.xlu1 %1151 }
 0x34f   :  { %v2268_v40 = vpop.eup %1921 }
 0x350   :  { %v1924_v41 = vpop.eup %1923  ;;  %v895_v42 = vsel %vm228_vm2, %v2268_v40, 0.0 }
 0x351   :  { %v1926_v43 = vpop.eup %1925  ;;  %896 = vadd.xlane.f32.xlu1 %v895_v42  ;;  %v892_v44 = vsel %vm228_vm2, %v1924_v41, 0.0  ;;  %v1304_v58 = vpop.permute.xlu1 %1303 }
 0x352   :  { %893 = vadd.xlane.f32.xlu0 %v892_v44  ;;  %v883_v46 = vsel %vm228_vm2, %v1926_v43, 0.0 }
 0x353   :  { %v1928_v45 = vpop.eup %1927 }
 0x354   :  { %v2274_v47 = vpop.eup %1929  ;;  %v898_v48 = vsel %vm228_vm2, %v1928_v45, 0.0 }
 0x355   :  { %884 = vadd.xlane.f32.xlu1 %v883_v46  ;;  %v901_v50 = vsel %vm228_vm2, %v2274_v47, 0.0 }
 0x356   :  { %899 = vadd.xlane.f32.xlu0 %v898_v48 }
 0x357   :  { %v1932_v49 = vpop.eup %1931 }
 0x358   :  { %v904_v51 = vsel %vm228_vm2, %v1932_v49, 0.0  ;;  %v1934_v52 = vpop.eup %1933 }
 0x359   :  { %902 = vadd.xlane.f32.xlu1 %v901_v50  ;;  %v889_v53 = vsel %vm228_vm2, %v1934_v52, 0.0 }
 0x35a   :  { %905 = vadd.xlane.f32.xlu0 %v904_v51 }
 0x35d   :  { %890 = vadd.xlane.f32.xlu1 %v889_v53 }
 0x36e   :  { %1455 = vrot.lane.b32.xlu1 %v2189_v17, %s2076_s28 }
 0x370   :  { %1379 = vrot.lane.b32.xlu0 %v2185_v16, %s2076_s28 }
 0x3d2   :  { %v888_v57 = vpop.xlane.xlu0 %887 }
 0x3d3   :  { %1935 = vrcp.f32 %v888_v57 }
 0x3da   :  { %v897_v59 = vpop.xlane.xlu1 %896 }
 0x3db   :  { %v894_v60 = vpop.xlane.xlu0 %893 }
 0x3dc   :  { %1937 = vrcp.f32 %v894_v60 }
 0x3de   :  { %v885_v61 = vpop.xlane.xlu1 %884 }
 0x3df   :  { %1939 = vrcp.f32 %v885_v61  ;;  %v900_v62 = vpop.xlane.xlu0 %899 }
 0x3e0   :  { %v1936_v63 = vpop.eup %1935  ;;  %1941 = vrcp.f32 %v900_v62 }
 0x3e1   :  { %v910_v0 = vmul.f32 %v1936_v63, %v1920_v35 }
 0x3e2   :  { %v903_v1 = vpop.xlane.xlu1 %902 }
 0x3e3   :  { %v906_v17 = vpop.xlane.xlu0 %905  ;;  %1859 = vmatmul.mubr.msk.f32.vlgmr.msra.gmra.mxu1 %vm228_vm2, %v910_v0 }
 0x3e4   :  { %1943 = vrcp.f32 %v906_v17  ;;  %1867 = vmatpush3.msra.mxu1 %v1152_v56  ;;  %1868 = vmatprep.mubr.msk.f32.mxu1 %vm2072_vm1, %v2069_v7 }
 0x3e5   :  { %1876 = vmatprep.subr.mxu1 %v2069_v7 }
 0x3e6   :  { %v891_v16 = vpop.xlane.xlu1 %890 }
 0x3e7   :  { %1945 = vrcp.f32 %v891_v16  ;;  %v1380_v12 = vpop.permute.xlu0 %1379 }
 0x3e8   :  { %1947 = vrcp.f32 %v897_v59 }
 0x3e9   :  { %v1938_v3 = vpop.eup %1937  ;;  %1949 = vrcp.f32 %v903_v1 }
 0x3ea   :  { %v914_v4 = vmul.f32 %v1938_v3, %v1924_v41  ;;  %v1456_v19 = vpop.permute.xlu1 %1455 }
 0x3ec   :  { %v1940_v6 = vpop.eup %1939  ;;  %1869 = vmatmul.mubr.msk.f32.vlgmr.msra.gmra.mxu1 %vm228_vm2, %v914_v4 }
 0x3ed   :  { %v1942_v8 = vpop.eup %1941  ;;  %1877 = vmatpush3.msra.mxu1 %v1304_v58  ;;  %1878 = vmatprep.mubr.msk.f32.mxu1 %vm2072_vm1, %v2069_v7  ;;  %v908_v9 = vmul.f32 %v1940_v6, %v1926_v43 }
 0x3ee   :  { %1886 = vmatprep.subr.mxu1 %v2069_v7  ;;  %v918_v18 = vmul.f32 %v1942_v8, %v1928_v45 }
 0x3ef   :  { %1854 = vmatmul.mubr.msk.f32.vlgmr.msra.gmra.mxu0 %vm228_vm2, %v908_v9 }
 0x3f0   :  { %1862 = vmatpush3.msra.mxu0 %v1076_v54  ;;  %1879 = vmatmul.mubr.msk.f32.vlgmr.msra.gmra.mxu1 %vm228_vm2, %v918_v18  ;;  %v1751_v54 = vld [vmem:[%s2345_s5] ss:$0 sm:$0xff] }
 0x3f1   :  { %v1944_v20 = vpop.eup %1943  ;;  %1887 = vmatpush3.msra.mxu1 %v1456_v19  ;;  %1888 = vmatprep.mubr.msk.f32.mxu1 %vm2072_vm1, %v2069_v7 }
 0x3f2   :  { %v922_v21 = vmul.f32 %v1944_v20, %v1932_v49  ;;  %1863 = vmatprep.mubr.msk.f32.mxu0 %vm2072_vm1, %v2069_v7  ;;  %1871 = vmatprep.subr.mxu0 %v2069_v7 }
 0x3f4   :  { %v1946_v10 = vpop.eup %1945  ;;  %1889 = vmatmul.mubr.msk.f32.vlgmr.msra.gmra.mxu1 %vm228_vm2, %v922_v21 }
 0x3f5   :  { %v912_v22 = vmul.f32 %v1946_v10, %v1934_v52  ;;  %v1948_v14 = vpop.eup %1947 }
 0x3f6   :  { %v916_v23 = vmul.f32 %v1948_v14, %v2268_v40  ;;  %v1950_v24 = vpop.eup %1949 }
 0x3f7   :  { %1864 = vmatmul.mubr.msk.f32.vlgmr.msra.gmra.mxu0 %vm228_vm2, %v912_v22  ;;  %v920_v25 = vmul.f32 %v1950_v24, %v2274_v47  ;;  %v1754_v22 = vld [vmem:[%s2346_s6] ss:$0 sm:$0xff] }
 0x3f8   :  { %1872 = vmatpush3.msra.mxu0 %v1228_v55  ;;  %1873 = vmatprep.mubr.msk.f32.mxu0 %vm2072_vm1, %v2069_v7 }
 0x3f9   :  { %1881 = vmatprep.subr.mxu0 %v2069_v7 }
 0x3fb   :  { %1874 = vmatmul.mubr.msk.f32.vlgmr.msra.gmra.mxu0 %vm228_vm2, %v916_v23  ;;  %v1755_v23 = vld [vmem:[%s2347_s7] ss:$0 sm:$0xff] }
 0x3fc   :  { %1882 = vmatpush3.msra.mxu0 %v1380_v12  ;;  %1883 = vmatprep.mubr.msk.f32.mxu0 %vm2072_vm1, %v2069_v7 }
 0x3fd   :  { %1891 = vmatprep.subr.mxu0 %v1566_v29 }
 0x3ff   :  { %1884 = vmatmul.mubr.msk.f32.vlgmr.msra.gmra.mxu0 %vm228_vm2, %v920_v25 }
 0x400   :  { %1892 = vmatpush3.msra.mxu0 %v1566_v29 }
 0x401   :  { %1893 = vmatprep.subr.mxu0 %v1565_v30 }
 0x402   :  { %1894 = vmatpush3.msra.mxu0 %v1565_v30 }
 0x403   :  { %1895 = vmatprep.subr.mxu0 %v1564_v32 }
 0x404   :  { %1896 = vmatpush3.msra.mxu0 %v1564_v32 }
 0x405   :  { %1897 = vmatprep.subr.mxu0 %v1563_v33 }
 0x406   :  { %1898 = vmatpush3.msra.mxu0 %v1563_v33 }
 0x4a3   :  { %v1071_v26 = vpop.f32.mrf.mxu1 }
 0x4a4   :  { %1533 = vrot.lane.b32.xlu0 %v1071_v26, %s2066_s14 }
 0x4a5   :  { %v1860_v13 = vpop.f32.mrf.mxu1 }
 0x4ac   :  { %v1223_v27 = vpop.f32.mrf.mxu1 }
 0x4ae   :  { %v1870_v28 = vpop.f32.mrf.mxu1 }
 0x4af   :  { %v995_v15 = vpop.f32.mrf.mxu0 }
 0x4b0   :  { %v1375_v11 = vpop.f32.mrf.mxu1 }
 0x4b1   :  { %1535 = vrot.lane.b32.xlu1 %v1375_v11, %s2066_s14  ;;  %v1855_v31 = vpop.f32.mrf.mxu0 }
 0x4b2   :  { %v1880_v7 = vpop.f32.mrf.mxu1 }
 0x4b4   :  { %v1527_v34 = vpop.f32.mrf.mxu1 }
 0x4b6   :  { %v1890_v35 = vpop.f32.mrf.mxu1 }
 0x4b7   :  { %v1147_v36 = vpop.f32.mrf.mxu0 }
 0x4b8   :  { %1541 = vrot.lane.b32.xlu0 %v1147_v36, %s2077_s29 }
 0x4b9   :  { %v1865_v37 = vpop.f32.mrf.mxu0 }
 0x4bb   :  { %v1299_v38 = vpop.f32.mrf.mxu0 }
 0x4bc   :  { %1549 = vrot.lane.b32.xlu0 %v1223_v27, %s2078_s30 }
 0x4bd   :  { %v1875_v39 = vpop.f32.mrf.mxu0 }
 0x4bf   :  { %v1451_v40 = vpop.f32.mrf.mxu0 }
 0x4c0   :  { %1543 = vrot.lane.b32.xlu1 %v1451_v40, %s2077_s29 }
 0x4c1   :  { %v1885_v41 = vpop.f32.mrf.mxu0 }
 0x4c4   :  { %1551 = vrot.lane.b32.xlu1 %v1527_v34, %s2078_s30 }
 0x516   :  { %v1534_v42 = vpop.permute.xlu0 %1533 }
 0x517   :  { %v1555_v44 = vsel %vm228_vm2, %v995_v15, %v1534_v42 }
 0x523   :  { %v1536_v45 = vpop.permute.xlu1 %1535 }
 0x524   :  { %v1556_v50 = vsel %vm228_vm2, %v1299_v38, %v1536_v45 }
 0x52a   :  { %v1542_v43 = vpop.permute.xlu0 %1541 }
 0x52b   :  { %v1558_v46 = vsel %vm1557_vm3, %v1555_v44, %v1542_v43 }
 0x52e   :  { %v1550_v47 = vpop.permute.xlu0 %1549 }
 0x52f   :  { %v1561_v48 = vsel %vm1560_vm4, %v1558_v46, %v1550_v47 }
 0x530   :  { %1899 = vmatprep.mubr.msk.f32.mxu0 %vm96_vm0, %v1561_v48 }
 0x532   :  { %v1544_v49 = vpop.permute.xlu1 %1543 }
 0x533   :  { %v1559_v51 = vsel %vm1557_vm3, %v1556_v50, %v1544_v49 }
 0x536   :  { %v1552_v52 = vpop.permute.xlu1 %1551 }
 0x537   :  { %v1562_v53 = vsel %vm1560_vm4, %v1559_v51, %v1552_v52 }
 0x538   :  { %1900 = vmatmul.mubr.msk.f32.vlgmr.msra.gmra.mxu0 %vm96_vm0, %v1562_v53 }
 0x5f8   :  { %v1901_v55 = vpop.f32.mrf.mxu0 }
 0x5f9   :  { %v1652_v56 = vadd.f32 %v1901_v55, %v1751_v54 }
 0x5fa   :  { %v1646_v57 = vpop.f32.mrf.mxu0 }
 0x5fb   :  { %v1647_v58 = vadd.f32 %v1751_v54, %v1646_v57  ;;  %v1656_v59 = vadd.f32 %v1652_v56, %v2150_v5 }
 0x5fd   :  { %v1660_v60 = vsel %vm96_vm0, %v1656_v59, 0.0  ;;  %v1655_v61 = vadd.f32 %v1647_v58, %v2146_v2 }
 0x5fe   :  { %1661 = vadd.xlane.f32.xlu1 %v1660_v60 }
 0x5ff   :  { %v1657_v62 = vsel %vm96_vm0, %v1655_v61, 0.0 }
 0x600   :  { %1658 = vadd.xlane.f32.xlu0 %v1657_v62 }
 0x687   :  { %v1662_v63 = vpop.xlane.xlu1 %1661 }
 0x688   :  { %v1665_v0 = vmul.f32 0.03125, %v1662_v63 }
 0x689   :  { %v1659_v1 = vpop.xlane.xlu0 %1658 }
 0x68a   :  { %v1664_v17 = vmul.f32 0.03125, %v1659_v1  ;;  %v1667_v16 = vsub.f32 %v1656_v59, %v1665_v0 }
 0x68c   :  { %v1666_v3 = vsub.f32 %v1655_v61, %v1664_v17  ;;  %v1669_v8 = vmul.f32 %v1667_v16, %v1667_v16 }
 0x68e   :  { %v1668_v4 = vmul.f32 %v1666_v3, %v1666_v3  ;;  %v1673_v5 = vsel %vm96_vm0, %v1669_v8, 0.0 }
 0x690   :  { %v1670_v6 = vsel %vm96_vm0, %v1668_v4, 0.0 }
 0x691   :  { %1671 = vadd.xlane.f32.xlu0 %v1670_v6 }
 0x695   :  { %1674 = vadd.xlane.f32.xlu0 %v1673_v5 }
 0x71a   :  { %v1672_v9 = vpop.xlane.xlu0 %1671 }
 0x71b   :  { %v1676_v2 = vmul.f32 0.03125, %v1672_v9 }
 0x71d   :  { %v1678_v18 = vadd.f32 1e-12, %v1676_v2 }
 0x71e   :  { %v1675_v19 = vpop.xlane.xlu0 %1674 }
 0x71f   :  { %1951 = vrsqrt.f32 %v1678_v18  ;;  %v1677_v20 = vmul.f32 0.03125, %v1675_v19 }
 0x721   :  { %v1679_v21 = vadd.f32 1e-12, %v1677_v20 }
 0x723   :  { %1953 = vrsqrt.f32 %v1679_v21 }
 0x72c   :  { %v1952_v10 = vpop.eup %1951 }
 0x72d   :  { %v1682_v14 = vmul.f32 %v1952_v10, %v1666_v3 }
 0x72f   :  { %v1691_v24 = vmul.f32 %v1754_v22, %v1682_v14 }
 0x730   :  { %v1954_v12 = vpop.eup %1953 }
 0x731   :  { %v1683_v25 = vmul.f32 %v1954_v12, %v1667_v16  ;;  %v1700_v26 = vadd.f32 %v1755_v23, %v1691_v24 }
 0x733   :  { %v1692_v13 = vmul.f32 %v1754_v22, %v1683_v25  ;;  %1702 = vst.msk [vmem:[#allocation10] sm:$0xff] %vm96_vm0, %v1700_v26 }
 0x735   :  { %v1701_v27 = vadd.f32 %v1755_v23, %v1692_v13 }
 0x737   :  { %1703 = vst.msk [vmem:[#allocation10 + $0x8] sm:$0xff] %vm96_vm0, %v1701_v27 }
 0x738   :  { %2046 = shalt.err (!%p2043_p10)
}
 0x739   :  { %1715 = dma.vmem_to_hbm [thread:$0]  %s1710_s17, 256, %s2348_s8, [#allocation4], %s2065_s13, %s2065_s13, %s2066_s14  }
 0x73a   :  { %2061 = dma.done.wait [#allocation4], 256  }
 0x73b   :  { %2062 = vsyncadd [#allocation4], 4294967040 }
 0x73c   :  { %1719 = vsyncpa [#allocation3], 1 }
 0x73d   :  { %1720 = vsyncpa [#allocation6], 1 }
 0x73e   :  { %1721 = vsyncpa [#allocation9], 1 }
 0x73f   :  { %1722 = vsyncpa [#allocation4], 1 }

</bundles_post_ra>
